<compile_context>
chip_gen: v5e
topology: v5e:2x2
jax: 0.10.0
libtpu: 0.0.40
codegen_flags: <defaults>
</compile_context>

<pallas_src>
import math
from functools import partial

import jax
import jax.numpy as jnp
import numpy as np
from jax.experimental import pallas as pl
from jax.experimental.pallas import tpu as pltpu


# ----------------------------------------------------------------------------
# Shared math helpers (f32 element-wise math everywhere; v5e-safe).
# ----------------------------------------------------------------------------
def _layernorm(t, g, eps):
    mu = jnp.mean(t, axis=-1, keepdims=True)
    var = jnp.mean((t - mu) ** 2, axis=-1, keepdims=True)
    return (t - mu) * jax.lax.rsqrt(var + eps) * g


def _l2norm_scale(t, sqrt_scale):
    ss = jnp.sum(t * t, axis=-1, keepdims=True)
    return t * (jax.lax.rsqrt(jnp.maximum(ss, 1e-24)) * sqrt_scale)


def _round_up(a, b):
    return (a + b - 1) // b * b


# ----------------------------------------------------------------------------
# Pre-pass kernel: LayerNorm(x) -> per-head normalized Q, normalized K, V.
# Runs once per token (grid (batch, n-tile)); outputs are in the matmul dtype.
# ----------------------------------------------------------------------------
def _qkv_prepass_kernel(x_ref, g_norm_ref, wq_ref, wk_ref, wv_ref,
                        q_out_ref, k_out_ref, v_out_ref, *,
                        heads, scale, eps, matmul_dtype):
    sqrt_scale = math.sqrt(scale)

    xn = _layernorm(x_ref[0].astype(jnp.float32), g_norm_ref[...], eps)  # (tn, dim)
    xn_c = xn.astype(matmul_dtype)

    k = jnp.dot(xn_c, wk_ref[...], preferred_element_type=jnp.float32)   # (tn, dh)
    v = jnp.dot(xn_c, wv_ref[...], preferred_element_type=jnp.float32)   # (tn, dh)
    k_out_ref[0] = _l2norm_scale(k, sqrt_scale).astype(k_out_ref.dtype)
    v_out_ref[0] = v.astype(v_out_ref.dtype)

    # NOTE: the PyTorch `q * scale` before l2norm cancels exactly, so it is dropped.
    for h in range(heads):                                               # static loop
        qh = jnp.dot(xn_c, wq_ref[h], preferred_element_type=jnp.float32)
        q_out_ref[0, h] = _l2norm_scale(qh, sqrt_scale).astype(q_out_ref.dtype)


# ----------------------------------------------------------------------------
# Flash kernel: one (batch, q-tile) owns the scratch; kv tiles stream.
# Fixed-max softmax (max = scale) thanks to the cosine-sim bound |sim| <= scale.
# ----------------------------------------------------------------------------
def _flash_attention_kernel(q_ref, k_ref, v_ref, nullkv_ref, w_out_ref, g_out_ref,
                            o_ref, q_scratch, l_scratch, acc_scratch, *,
                            heads, dim_head, scale, eps, seq_len, mask_tail,
                            matmul_dtype, exact_recip):
    ki = pl.program_id(2)
    tq = q_ref.shape[2]
    tk = k_ref.shape[1]
    dim = o_ref.shape[2]

    # ---- per-(batch, q-tile) init: stack heads along sublanes, seed the
    #      softmax state with the (pre-normalized) null key/value. ----
    @pl.when(ki == 0)
    def _init():
        for h in range(heads):                                   # static, once per q tile
            q_scratch[h * tq:(h + 1) * tq, :] = q_ref[0, h]
        qs_f = q_scratch[...].astype(jnp.float32)                # (heads*tq, dh)
        nk = nullkv_ref[0:1, :]                                  # normalized & scaled null k
        nv = nullkv_ref[1:2, :]                                  # raw null v
        sim_null = jnp.sum(qs_f * nk, axis=-1, keepdims=True)    # null-key logit
        l0 = jnp.exp(sim_null - scale)                           # fixed softmax max = scale
        l_scratch[...] = jnp.broadcast_to(l0, l_scratch.shape)
        acc_scratch[...] = l0 * nv

    # ---- this kv tile: one batched (heads*tq, dh) @ (dh, tk) MXU matmul ----
    qs = q_scratch[...]                                          # matmul_dtype
    k_s = k_ref[0]                                               # (tk, dh), normalized & scaled
    v = v_ref[0]                                                 # (tk, dh)
    sim = jax.lax.dot_general(qs, k_s, (((1,), (1,)), ((), ())),
                              preferred_element_type=jnp.float32)  # (heads*tq, tk)

    p = jnp.exp(sim - scale)                                     # exact: softmax shift invariance
    if mask_tail:                                                # static Python branch
        col = ki * tk + jax.lax.broadcasted_iota(jnp.int32, (1, tk), 1)
        p = jnp.where(col < seq_len, p, 0.0)

    l_scratch[...] = l_scratch[...] + jnp.sum(p, axis=-1, keepdims=True)
    acc_scratch[...] = acc_scratch[...] + jnp.dot(
        p.astype(matmul_dtype), v, preferred_element_type=jnp.float32)

    # ---- finalize: normalize, fold heads into the output projection, LayerNorm ----
    @pl.when(ki == pl.num_programs(2) - 1)
    def _finalize():
        inv_l = pl.reciprocal(l_scratch[:, 0:1], approx=not exact_recip)
        out_h = (acc_scratch[...] * inv_l).astype(matmul_dtype)  # (heads*tq, dh)
        out = jnp.zeros((tq, dim), jnp.float32)
        for h in range(heads):                                   # static, once per q tile
            out = out + jnp.dot(out_h[h * tq:(h + 1) * tq, :], w_out_ref[h],
                                preferred_element_type=jnp.float32)
        out = _layernorm(out, g_out_ref[...], eps)
        o_ref[0] = out.astype(o_ref.dtype)


# ----------------------------------------------------------------------------
# VMEM budgeting (lane/sublane padding aware), generation-aware tile defaults.
# ----------------------------------------------------------------------------
def _attn_vmem_bytes(tq, tk, dim, heads, dim_head, out_itemsize, mm_itemsize):
    dh_p = _round_up(dim_head, 128)
    dim_p = _round_up(dim, 128)
    tk_p = _round_up(tk, 128)
    rows = heads * tq
    blocks = 2 * (heads * tq * dh_p * mm_itemsize        # q block (double-buffered)
                  + 2 * tk * dh_p * mm_itemsize          # k + v blocks
                  + tq * dim_p * out_itemsize)           # output block
    weights = 2 * (heads * dim_head * dim_p * mm_itemsize  # w_out
                   + 8 * dh_p * 4 + 8 * dim_p * 4)         # null_kv, g_out (padded)
    scratch = (rows * dh_p * mm_itemsize                 # q scratch
               + 4 * rows * 128 + 4 * rows * dh_p)       # l, acc
    temps = 3 * rows * tk_p * 4                          # sim, p, masked p (f32)
    est = blocks + weights + scratch + temps
    return int(min(max(2 * est, 8 * 2 ** 20), 48 * 2 ** 20))


def _prepass_vmem_bytes(tn, dim, heads, dim_head, x_itemsize, mm_itemsize):
    dh_p = _round_up(dim_head, 128)
    dim_p = _round_up(dim, 128)
    blocks = 2 * (tn * dim_p * x_itemsize
                  + heads * tn * dh_p * mm_itemsize
                  + 2 * tn * dh_p * mm_itemsize)
    weights = 2 * ((heads + 2) * dim * dh_p * mm_itemsize + 8 * dim_p * 4)
    temps = 4 * tn * dim_p * 4
    est = blocks + weights + temps
    return int(min(max(2 * est, 8 * 2 ** 20), 48 * 2 ** 20))


def _default_tiles():
    # v5e (1 vst slot, 16 MiB scoped default) and v7x (64 MiB VMEM) prefer a
    # smaller q tile; v6e (128 MiB VMEM) takes the larger one.
    try:
        kind = jax.devices()[0].device_kind.lower()
    except Exception:  # pragma: no cover - defensive
        kind = ""
    small_vmem = ("v5e" in kind) or ("v5 lite" in kind) or ("v7" in kind)
    return (128, 256) if small_vmem else (256, 256)


# ----------------------------------------------------------------------------
# Wrapper
# ----------------------------------------------------------------------------
def attention_pallas(x, params, *, heads, dim_head, scale=16.0, eps=1e-5,
                     q_tile=None, kv_tile=None, matmul_dtype=jnp.bfloat16):
    """Forward pass of the DALLE2 Attention module (default config)."""
    b, n, dim = x.shape
    dq, dk = _default_tiles()
    q_tile = q_tile or dq
    kv_tile = kv_tile or dk

    # Pad the sequence to the tile size (16-row granularity keeps bf16 sublane
    # slices aligned); padded kv columns are masked in-kernel.
    tq = min(q_tile, _round_up(n, 16))
    tk = min(kv_tile, _round_up(n, 16))
    n_pad = _round_up(n, tq)
    while n_pad % tk:
        n_pad += tq
    num_q = n_pad // tq
    num_k = n_pad // tk
    mask_tail = n_pad != n
    if mask_tail:
        x = jnp.pad(x, ((0, 0), (0, n_pad - n), (0, 0)))

    exact_recip = jnp.dtype(matmul_dtype) == jnp.dtype(jnp.float32)
    mm_itemsize = jnp.dtype(matmul_dtype).itemsize
    out_itemsize = jnp.dtype(x.dtype).itemsize

    g_norm = params["g_norm"].reshape(1, dim).astype(jnp.float32)
    g_out = params["g_out"].reshape(1, dim).astype(jnp.float32)
    # Pre-cast weights to the matmul dtype; per-head slabs avoid in-kernel lane slicing.
    wq3 = (params["wq"].reshape(dim, heads, dim_head)
           .transpose(1, 0, 2).astype(matmul_dtype))               # (heads, dim, dh)
    wk = params["wkv"][:, :dim_head].astype(matmul_dtype)           # (dim, dh)
    wv = params["wkv"][:, dim_head:].astype(matmul_dtype)           # (dim, dh)
    w_out3 = params["w_out"].reshape(heads, dim_head, dim).astype(matmul_dtype)
    # Normalize the null key once on the host side (l2norm * sqrt(scale)); null value raw.
    null_k = params["null_kv"][0:1].astype(jnp.float32)
    null_k = null_k * (math.sqrt(scale) / jnp.maximum(
        jnp.linalg.norm(null_k, axis=-1, keepdims=True), 1e-12))
    null_kv = jnp.concatenate(
        [null_k, params["null_kv"][1:2].astype(jnp.float32)], axis=0)  # (2, dh) f32

    # ---------------- pre-pass: LayerNorm + projections + l2norm ----------------
    tn = tk
    num_n = n_pad // tn
    prep_kernel = partial(_qkv_prepass_kernel, heads=heads, scale=scale, eps=eps,
                          matmul_dtype=matmul_dtype)
    q_norm, k_norm, v_proj = pl.pallas_call(
        prep_kernel,
        out_shape=(jax.ShapeDtypeStruct((b, heads, n_pad, dim_head), matmul_dtype),
                   jax.ShapeDtypeStruct((b, n_pad, dim_head), matmul_dtype),
                   jax.ShapeDtypeStruct((b, n_pad, dim_head), matmul_dtype)),
        grid_spec=pltpu.PrefetchScalarGridSpec(
            num_scalar_prefetch=0,
            grid=(b, num_n),
            in_specs=[
                pl.BlockSpec((1, tn, dim), lambda bi, ni: (bi, ni, 0)),        # x
                pl.BlockSpec((1, dim), lambda bi, ni: (0, 0)),                 # g_norm
                pl.BlockSpec((heads, dim, dim_head), lambda bi, ni: (0, 0, 0)),  # wq3
                pl.BlockSpec((dim, dim_head), lambda bi, ni: (0, 0)),          # wk
                pl.BlockSpec((dim, dim_head), lambda bi, ni: (0, 0)),          # wv
            ],
            out_specs=[
                pl.BlockSpec((1, heads, tn, dim_head), lambda bi, ni: (bi, 0, ni, 0)),
                pl.BlockSpec((1, tn, dim_head), lambda bi, ni: (bi, ni, 0)),
                pl.BlockSpec((1, tn, dim_head), lambda bi, ni: (bi, ni, 0)),
            ],
        ),
        compiler_params=pltpu.CompilerParams(
            dimension_semantics=("parallel", "parallel"),
            vmem_limit_bytes=_prepass_vmem_bytes(tn, dim, heads, dim_head,
                                                 out_itemsize, mm_itemsize)),
    )(x, g_norm, wq3, wk, wv)

    # ---------------- flash attention + output projection + LayerNorm -----------
    kernel = partial(_flash_attention_kernel, heads=heads, dim_head=dim_head,
                     scale=scale, eps=eps, seq_len=n, mask_tail=mask_tail,
                     matmul_dtype=matmul_dtype, exact_recip=exact_recip)

    out_pad = pl.pallas_call(
        kernel,
        out_shape=jax.ShapeDtypeStruct((b, n_pad, dim), x.dtype),
        grid_spec=pltpu.PrefetchScalarGridSpec(
            num_scalar_prefetch=0,
            grid=(b, num_q, num_k),
            in_specs=[
                pl.BlockSpec((1, heads, tq, dim_head), lambda bi, qi, ki: (bi, 0, qi, 0)),
                pl.BlockSpec((1, tk, dim_head), lambda bi, qi, ki: (bi, ki, 0)),
                pl.BlockSpec((1, tk, dim_head), lambda bi, qi, ki: (bi, ki, 0)),
                pl.BlockSpec((2, dim_head), lambda bi, qi, ki: (0, 0)),          # null_kv
                pl.BlockSpec((heads, dim_head, dim), lambda bi, qi, ki: (0, 0, 0)),  # w_out3
                pl.BlockSpec((1, dim), lambda bi, qi, ki: (0, 0)),               # g_out
            ],
            out_specs=pl.BlockSpec((1, tq, dim), lambda bi, qi, ki: (bi, qi, 0)),
            scratch_shapes=[
                pltpu.VMEM((heads * tq, dim_head), matmul_dtype),   # head-stacked q
                pltpu.VMEM((heads * tq, 128), jnp.float32),         # softmax denom (lane-broadcast)
                pltpu.VMEM((heads * tq, dim_head), jnp.float32),    # weighted-V accumulator
            ],
        ),
        compiler_params=pltpu.CompilerParams(
            dimension_semantics=("parallel", "parallel", "arbitrary"),
            vmem_limit_bytes=_attn_vmem_bytes(tq, tk, dim, heads, dim_head,
                                              out_itemsize, mm_itemsize)),
    )(q_norm, k_norm, v_proj, null_kv, w_out3, g_out)

    return out_pad[:, :n, :] if mask_tail else out_pad


# ----------------------------------------------------------------------------
# Pure-JAX f32 reference (mirrors the PyTorch forward) for correctness checks.
# ----------------------------------------------------------------------------
def attention_ref(x, params, *, heads, dim_head, scale=16.0, eps=1e-5):
    b, n, dim = x.shape

    def l2norm(t):
        return t / jnp.maximum(jnp.linalg.norm(t, axis=-1, keepdims=True), 1e-12)

    def layernorm(t, g):
        m = jnp.mean(t, axis=-1, keepdims=True)
        v = jnp.mean((t - m) ** 2, axis=-1, keepdims=True)
        return (t - m) * jax.lax.rsqrt(v + eps) * g

    xn = layernorm(x, params["g_norm"])
    q = xn @ params["wq"]
    kv = xn @ params["wkv"]
    k, v = kv[..., :dim_head], kv[..., dim_head:]

    q = q.reshape(b, n, heads, dim_head).transpose(0, 2, 1, 3)   # (b, h, n, dh)
    q = q * scale

    nk = jnp.broadcast_to(params["null_kv"][0], (b, 1, dim_head))
    nv = jnp.broadcast_to(params["null_kv"][1], (b, 1, dim_head))
    k = jnp.concatenate([nk, k], axis=-2)
    v = jnp.concatenate([nv, v], axis=-2)

    q, k = l2norm(q), l2norm(k)
    q = q * math.sqrt(scale)
    k = k * math.sqrt(scale)

    sim = jnp.einsum("bhid,bjd->bhij", q, k)
    attn = jax.nn.softmax(sim.astype(jnp.float32), axis=-1).astype(sim.dtype)
    out = jnp.einsum("bhij,bjd->bhid", attn, v)
    out = out.transpose(0, 2, 1, 3).reshape(b, n, heads * dim_head)
    out = out @ params["w_out"]
    return layernorm(out, params["g_out"])


# ----------------------------------------------------------------------------
if __name__ == "__main__":
    B, N, DIM = 2, 8, 32
    HEADS, DIM_HEAD = 4, 16
    INNER = HEADS * DIM_HEAD
    SCALE = 16.0            # cosine_sim_scale

    key = jax.random.PRNGKey(0)
    kx, k1, k2, k3, k4 = jax.random.split(key, 5)

    x = jax.random.normal(kx, (B, N, DIM), dtype=jnp.float32)

    params = {
        "g_norm": jnp.ones((DIM,), jnp.float32),                               # LayerNorm gain
        "wq": jax.random.normal(k1, (DIM, INNER), jnp.float32) / math.sqrt(DIM),
        "wkv": jax.random.normal(k2, (DIM, 2 * DIM_HEAD), jnp.float32) / math.sqrt(DIM),
        "null_kv": jax.random.normal(k3, (2, DIM_HEAD), jnp.float32),
        "w_out": jax.random.normal(k4, (INNER, DIM), jnp.float32) / math.sqrt(INNER),
        "g_out": jnp.ones((DIM,), jnp.float32),                                # output LayerNorm gain
    }

    ref = attention_ref(x, params, heads=HEADS, dim_head=DIM_HEAD, scale=SCALE)

    # 1) f32-MXU path: validates the math (fixed-max softmax, null-kv folding,
    #    head batching, padding/masking) tightly against the f32 reference.
    out_f32 = attention_pallas(x, params, heads=HEADS, dim_head=DIM_HEAD,
                               scale=SCALE, matmul_dtype=jnp.float32)
    out_f32 = jax.block_until_ready(out_f32)
    np.testing.assert_allclose(np.asarray(out_f32), np.asarray(ref),
                               rtol=2e-2, atol=2e-2)

    # 2) default perf path (bf16 MXU operands, f32 accumulation): operand
    #    quantization widens the tolerance vs. the pure-f32 reference.
    out_bf16 = attention_pallas(x, params, heads=HEADS, dim_head=DIM_HEAD, scale=SCALE)
    out_bf16 = jax.block_until_ready(out_bf16)
    np.testing.assert_allclose(np.asarray(out_bf16), np.asarray(ref),
                               rtol=1e-1, atol=1e-1)

    print("KERNEL_OK")
</pallas_src>

<mosaic_0001>
module attributes {stable_mosaic.version = 11 : i64} {
  func.func @_qkv_prepass_kernel(%arg0: i32, %arg1: i32, %arg2: memref<1x16x32xf32, #tpu.memory_space<vmem>>, %arg3: memref<1x32xf32, #tpu.memory_space<vmem>>, %arg4: memref<4x32x16xf32, #tpu.memory_space<vmem>>, %arg5: memref<32x16xf32, #tpu.memory_space<vmem>>, %arg6: memref<32x16xf32, #tpu.memory_space<vmem>>, %arg7: memref<1x4x16x16xf32, #tpu.memory_space<vmem>>, %arg8: memref<1x16x16xf32, #tpu.memory_space<vmem>>, %arg9: memref<1x16x16xf32, #tpu.memory_space<vmem>>) attributes {dimension_semantics = [#tpu.dimension_semantics<parallel>, #tpu.dimension_semantics<parallel>], iteration_bounds = array<i64: 2, 1>, scalar_prefetch = 0 : i64, scratch_operands = 0 : i64, tpu.core_type = #tpu.core_type<tc>, window_params = [{transform_indices = @transform_0, window_bounds = array<i64: 1, 16, 32>}, {pipeline_mode = #tpu.pipeline_mode<synchronous>, transform_indices = @transform_1, window_bounds = array<i64: 1, 32>}, {pipeline_mode = #tpu.pipeline_mode<synchronous>, transform_indices = @transform_2, window_bounds = array<i64: 4, 32, 16>}, {pipeline_mode = #tpu.pipeline_mode<synchronous>, transform_indices = @transform_3, window_bounds = array<i64: 32, 16>}, {pipeline_mode = #tpu.pipeline_mode<synchronous>, transform_indices = @transform_4, window_bounds = array<i64: 32, 16>}, {transform_indices = @transform_5, window_bounds = array<i64: 1, 4, 16, 16>}, {transform_indices = @transform_6, window_bounds = array<i64: 1, 16, 16>}, {transform_indices = @transform_7, window_bounds = array<i64: 1, 16, 16>}]} {
    %c0 = arith.constant 0 : index
    %c0_0 = arith.constant 0 : index
    %c0_1 = arith.constant 0 : index
    %0 = vector.load %arg2[%c0, %c0_0, %c0_1] : memref<1x16x32xf32, #tpu.memory_space<vmem>>, vector<1x16x32xf32>
    %1 = vector.shape_cast %0 : vector<1x16x32xf32> to vector<16x32xf32>
    %c0_2 = arith.constant 0 : index
    %c0_3 = arith.constant 0 : index
    %2 = vector.load %arg3[%c0_2, %c0_3] : memref<1x32xf32, #tpu.memory_space<vmem>>, vector<1x32xf32>
    %cst = arith.constant dense<0.000000e+00> : vector<16xf32>
    %3 = vector.multi_reduction <add>, %1, %cst [1] : vector<16x32xf32> to vector<16xf32>
    %4 = vector.shape_cast %3 : vector<16xf32> to vector<16x1xf32>
    %cst_4 = arith.constant 3.200000e+01 : f32
    %5 = vector.broadcast %cst_4 : f32 to vector<16x1xf32>
    %6 = arith.divf %4, %5 : vector<16x1xf32>
    %7 = vector.broadcast %6 : vector<16x1xf32> to vector<16x32xf32>
    %8 = arith.subf %1, %7 : vector<16x32xf32>
    %9 = arith.mulf %8, %8 : vector<16x32xf32>
    %cst_5 = arith.constant dense<0.000000e+00> : vector<16xf32>
    %10 = vector.multi_reduction <add>, %9, %cst_5 [1] : vector<16x32xf32> to vector<16xf32>
    %11 = vector.shape_cast %10 : vector<16xf32> to vector<16x1xf32>
    %cst_6 = arith.constant 3.200000e+01 : f32
    %12 = vector.broadcast %cst_6 : f32 to vector<16x1xf32>
    %13 = arith.divf %11, %12 : vector<16x1xf32>
    %14 = vector.broadcast %6 : vector<16x1xf32> to vector<16x32xf32>
    %15 = arith.subf %1, %14 : vector<16x32xf32>
    %cst_7 = arith.constant 9.99999974E-6 : f32
    %16 = vector.broadcast %cst_7 : f32 to vector<16x1xf32>
    %17 = arith.addf %13, %16 : vector<16x1xf32>
    %18 = math.rsqrt %17 : vector<16x1xf32>
    %19 = vector.broadcast %18 : vector<16x1xf32> to vector<16x32xf32>
    %20 = arith.mulf %15, %19 : vector<16x32xf32>
    %21 = vector.broadcast %2 : vector<1x32xf32> to vector<16x32xf32>
    %22 = arith.mulf %20, %21 : vector<16x32xf32>
    %c0_8 = arith.constant 0 : index
    %c0_9 = arith.constant 0 : index
    %23 = vector.load %arg5[%c0_8, %c0_9] : memref<32x16xf32, #tpu.memory_space<vmem>>, vector<32x16xf32>
    %cst_10 = arith.constant dense<0.000000e+00> : vector<16x16xf32>
    %24 = tpu.matmul %22, %23, %cst_10 {dimension_numbers = #tpu.dot_dimension_numbers<[1], [0], [0], [1], [0, 0, 1, 1], [], []>} : vector<16x32xf32>, vector<32x16xf32>, vector<16x16xf32> -> vector<16x16xf32>
    %c0_11 = arith.constant 0 : index
    %c0_12 = arith.constant 0 : index
    %25 = vector.load %arg6[%c0_11, %c0_12] : memref<32x16xf32, #tpu.memory_space<vmem>>, vector<32x16xf32>
    %cst_13 = arith.constant dense<0.000000e+00> : vector<16x16xf32>
    %26 = tpu.matmul %22, %25, %cst_13 {dimension_numbers = #tpu.dot_dimension_numbers<[1], [0], [0], [1], [0, 0, 1, 1], [], []>} : vector<16x32xf32>, vector<32x16xf32>, vector<16x16xf32> -> vector<16x16xf32>
    %27 = arith.mulf %24, %24 : vector<16x16xf32>
    %cst_14 = arith.constant dense<0.000000e+00> : vector<16xf32>
    %28 = vector.multi_reduction <add>, %27, %cst_14 [1] : vector<16x16xf32> to vector<16xf32>
    %29 = vector.shape_cast %28 : vector<16xf32> to vector<16x1xf32>
    %cst_15 = arith.constant 1.000000e-24 : f32
    %30 = vector.broadcast %cst_15 : f32 to vector<16x1xf32>
    %31 = arith.maximumf %29, %30 : vector<16x1xf32>
    %32 = math.rsqrt %31 : vector<16x1xf32>
    %cst_16 = arith.constant 4.000000e+00 : f32
    %33 = vector.broadcast %cst_16 : f32 to vector<16x1xf32>
    %34 = arith.mulf %32, %33 : vector<16x1xf32>
    %35 = vector.broadcast %34 : vector<16x1xf32> to vector<16x16xf32>
    %36 = arith.mulf %24, %35 : vector<16x16xf32>
    %c0_17 = arith.constant 0 : index
    %c0_18 = arith.constant 0 : index
    %c0_19 = arith.constant 0 : index
    %37 = vector.load %arg8[%c0_17, %c0_18, %c0_19] : memref<1x16x16xf32, #tpu.memory_space<vmem>>, vector<1x16x16xf32>
    %38 = vector.shape_cast %37 : vector<1x16x16xf32> to vector<16x16xf32>
    %39 = vector.shape_cast %36 : vector<16x16xf32> to vector<1x16x16xf32>
    tpu.vector_store %arg8[%c0_17, %c0_18, %c0_19], %39 {strides = array<i32>} : memref<1x16x16xf32, #tpu.memory_space<vmem>>, vector<1x16x16xf32>,
    %c0_20 = arith.constant 0 : index
    %c0_21 = arith.constant 0 : index
    %c0_22 = arith.constant 0 : index
    %40 = vector.load %arg9[%c0_20, %c0_21, %c0_22] : memref<1x16x16xf32, #tpu.memory_space<vmem>>, vector<1x16x16xf32>
    %41 = vector.shape_cast %40 : vector<1x16x16xf32> to vector<16x16xf32>
    %42 = vector.shape_cast %26 : vector<16x16xf32> to vector<1x16x16xf32>
    tpu.vector_store %arg9[%c0_20, %c0_21, %c0_22], %42 {strides = array<i32>} : memref<1x16x16xf32, #tpu.memory_space<vmem>>, vector<1x16x16xf32>,
    %c0_23 = arith.constant 0 : index
    %c0_24 = arith.constant 0 : index
    %c0_25 = arith.constant 0 : index
    %43 = vector.load %arg4[%c0_23, %c0_24, %c0_25] : memref<4x32x16xf32, #tpu.memory_space<vmem>>, vector<1x32x16xf32>
    %44 = vector.shape_cast %43 : vector<1x32x16xf32> to vector<32x16xf32>
    %cst_26 = arith.constant dense<0.000000e+00> : vector<16x16xf32>
    %45 = tpu.matmul %22, %44, %cst_26 {dimension_numbers = #tpu.dot_dimension_numbers<[1], [0], [0], [1], [0, 0, 1, 1], [], []>} : vector<16x32xf32>, vector<32x16xf32>, vector<16x16xf32> -> vector<16x16xf32>
    %46 = arith.mulf %45, %45 : vector<16x16xf32>
    %cst_27 = arith.constant dense<0.000000e+00> : vector<16xf32>
    %47 = vector.multi_reduction <add>, %46, %cst_27 [1] : vector<16x16xf32> to vector<16xf32>
    %48 = vector.shape_cast %47 : vector<16xf32> to vector<16x1xf32>
    %cst_28 = arith.constant 1.000000e-24 : f32
    %49 = vector.broadcast %cst_28 : f32 to vector<16x1xf32>
    %50 = arith.maximumf %48, %49 : vector<16x1xf32>
    %51 = math.rsqrt %50 : vector<16x1xf32>
    %cst_29 = arith.constant 4.000000e+00 : f32
    %52 = vector.broadcast %cst_29 : f32 to vector<16x1xf32>
    %53 = arith.mulf %51, %52 : vector<16x1xf32>
    %54 = vector.broadcast %53 : vector<16x1xf32> to vector<16x16xf32>
    %55 = arith.mulf %45, %54 : vector<16x16xf32>
    %c0_30 = arith.constant 0 : index
    %c0_31 = arith.constant 0 : index
    %c0_32 = arith.constant 0 : index
    %c0_33 = arith.constant 0 : index
    %56 = vector.load %arg7[%c0_30, %c0_31, %c0_32, %c0_33] : memref<1x4x16x16xf32, #tpu.memory_space<vmem>>, vector<1x1x16x16xf32>
    %57 = vector.shape_cast %56 : vector<1x1x16x16xf32> to vector<16x16xf32>
    %58 = vector.shape_cast %55 : vector<16x16xf32> to vector<1x1x16x16xf32>
    tpu.vector_store %arg7[%c0_30, %c0_31, %c0_32, %c0_33], %58 {strides = array<i32>} : memref<1x4x16x16xf32, #tpu.memory_space<vmem>>, vector<1x1x16x16xf32>,
    %c1 = arith.constant 1 : index
    %c0_34 = arith.constant 0 : index
    %c0_35 = arith.constant 0 : index
    %59 = vector.load %arg4[%c1, %c0_34, %c0_35] : memref<4x32x16xf32, #tpu.memory_space<vmem>>, vector<1x32x16xf32>
    %60 = vector.shape_cast %59 : vector<1x32x16xf32> to vector<32x16xf32>
    %cst_36 = arith.constant dense<0.000000e+00> : vector<16x16xf32>
    %61 = tpu.matmul %22, %60, %cst_36 {dimension_numbers = #tpu.dot_dimension_numbers<[1], [0], [0], [1], [0, 0, 1, 1], [], []>} : vector<16x32xf32>, vector<32x16xf32>, vector<16x16xf32> -> vector<16x16xf32>
    %62 = arith.mulf %61, %61 : vector<16x16xf32>
    %cst_37 = arith.constant dense<0.000000e+00> : vector<16xf32>
    %63 = vector.multi_reduction <add>, %62, %cst_37 [1] : vector<16x16xf32> to vector<16xf32>
    %64 = vector.shape_cast %63 : vector<16xf32> to vector<16x1xf32>
    %cst_38 = arith.constant 1.000000e-24 : f32
    %65 = vector.broadcast %cst_38 : f32 to vector<16x1xf32>
    %66 = arith.maximumf %64, %65 : vector<16x1xf32>
    %67 = math.rsqrt %66 : vector<16x1xf32>
    %cst_39 = arith.constant 4.000000e+00 : f32
    %68 = vector.broadcast %cst_39 : f32 to vector<16x1xf32>
    %69 = arith.mulf %67, %68 : vector<16x1xf32>
    %70 = vector.broadcast %69 : vector<16x1xf32> to vector<16x16xf32>
    %71 = arith.mulf %61, %70 : vector<16x16xf32>
    %c0_40 = arith.constant 0 : index
    %c1_41 = arith.constant 1 : index
    %c0_42 = arith.constant 0 : index
    %c0_43 = arith.constant 0 : index
    %72 = vector.load %arg7[%c0_40, %c1_41, %c0_42, %c0_43] : memref<1x4x16x16xf32, #tpu.memory_space<vmem>>, vector<1x1x16x16xf32>
    %73 = vector.shape_cast %72 : vector<1x1x16x16xf32> to vector<16x16xf32>
    %74 = vector.shape_cast %71 : vector<16x16xf32> to vector<1x1x16x16xf32>
    tpu.vector_store %arg7[%c0_40, %c1_41, %c0_42, %c0_43], %74 {strides = array<i32>} : memref<1x4x16x16xf32, #tpu.memory_space<vmem>>, vector<1x1x16x16xf32>,
    %c2 = arith.constant 2 : index
    %c0_44 = arith.constant 0 : index
    %c0_45 = arith.constant 0 : index
    %75 = vector.load %arg4[%c2, %c0_44, %c0_45] : memref<4x32x16xf32, #tpu.memory_space<vmem>>, vector<1x32x16xf32>
    %76 = vector.shape_cast %75 : vector<1x32x16xf32> to vector<32x16xf32>
    %cst_46 = arith.constant dense<0.000000e+00> : vector<16x16xf32>
    %77 = tpu.matmul %22, %76, %cst_46 {dimension_numbers = #tpu.dot_dimension_numbers<[1], [0], [0], [1], [0, 0, 1, 1], [], []>} : vector<16x32xf32>, vector<32x16xf32>, vector<16x16xf32> -> vector<16x16xf32>
    %78 = arith.mulf %77, %77 : vector<16x16xf32>
    %cst_47 = arith.constant dense<0.000000e+00> : vector<16xf32>
    %79 = vector.multi_reduction <add>, %78, %cst_47 [1] : vector<16x16xf32> to vector<16xf32>
    %80 = vector.shape_cast %79 : vector<16xf32> to vector<16x1xf32>
    %cst_48 = arith.constant 1.000000e-24 : f32
    %81 = vector.broadcast %cst_48 : f32 to vector<16x1xf32>
    %82 = arith.maximumf %80, %81 : vector<16x1xf32>
    %83 = math.rsqrt %82 : vector<16x1xf32>
    %cst_49 = arith.constant 4.000000e+00 : f32
    %84 = vector.broadcast %cst_49 : f32 to vector<16x1xf32>
    %85 = arith.mulf %83, %84 : vector<16x1xf32>
    %86 = vector.broadcast %85 : vector<16x1xf32> to vector<16x16xf32>
    %87 = arith.mulf %77, %86 : vector<16x16xf32>
    %c0_50 = arith.constant 0 : index
    %c2_51 = arith.constant 2 : index
    %c0_52 = arith.constant 0 : index
    %c0_53 = arith.constant 0 : index
    %88 = vector.load %arg7[%c0_50, %c2_51, %c0_52, %c0_53] : memref<1x4x16x16xf32, #tpu.memory_space<vmem>>, vector<1x1x16x16xf32>
    %89 = vector.shape_cast %88 : vector<1x1x16x16xf32> to vector<16x16xf32>
    %90 = vector.shape_cast %87 : vector<16x16xf32> to vector<1x1x16x16xf32>
    tpu.vector_store %arg7[%c0_50, %c2_51, %c0_52, %c0_53], %90 {strides = array<i32>} : memref<1x4x16x16xf32, #tpu.memory_space<vmem>>, vector<1x1x16x16xf32>,
    %c3 = arith.constant 3 : index
    %c0_54 = arith.constant 0 : index
    %c0_55 = arith.constant 0 : index
    %91 = vector.load %arg4[%c3, %c0_54, %c0_55] : memref<4x32x16xf32, #tpu.memory_space<vmem>>, vector<1x32x16xf32>
    %92 = vector.shape_cast %91 : vector<1x32x16xf32> to vector<32x16xf32>
    %cst_56 = arith.constant dense<0.000000e+00> : vector<16x16xf32>
    %93 = tpu.matmul %22, %92, %cst_56 {dimension_numbers = #tpu.dot_dimension_numbers<[1], [0], [0], [1], [0, 0, 1, 1], [], []>} : vector<16x32xf32>, vector<32x16xf32>, vector<16x16xf32> -> vector<16x16xf32>
    %94 = arith.mulf %93, %93 : vector<16x16xf32>
    %cst_57 = arith.constant dense<0.000000e+00> : vector<16xf32>
    %95 = vector.multi_reduction <add>, %94, %cst_57 [1] : vector<16x16xf32> to vector<16xf32>
    %96 = vector.shape_cast %95 : vector<16xf32> to vector<16x1xf32>
    %cst_58 = arith.constant 1.000000e-24 : f32
    %97 = vector.broadcast %cst_58 : f32 to vector<16x1xf32>
    %98 = arith.maximumf %96, %97 : vector<16x1xf32>
    %99 = math.rsqrt %98 : vector<16x1xf32>
    %cst_59 = arith.constant 4.000000e+00 : f32
    %100 = vector.broadcast %cst_59 : f32 to vector<16x1xf32>
    %101 = arith.mulf %99, %100 : vector<16x1xf32>
    %102 = vector.broadcast %101 : vector<16x1xf32> to vector<16x16xf32>
    %103 = arith.mulf %93, %102 : vector<16x16xf32>
    %c0_60 = arith.constant 0 : index
    %c3_61 = arith.constant 3 : index
    %c0_62 = arith.constant 0 : index
    %c0_63 = arith.constant 0 : index
    %104 = vector.load %arg7[%c0_60, %c3_61, %c0_62, %c0_63] : memref<1x4x16x16xf32, #tpu.memory_space<vmem>>, vector<1x1x16x16xf32>
    %105 = vector.shape_cast %104 : vector<1x1x16x16xf32> to vector<16x16xf32>
    %106 = vector.shape_cast %103 : vector<16x16xf32> to vector<1x1x16x16xf32>
    tpu.vector_store %arg7[%c0_60, %c3_61, %c0_62, %c0_63], %106 {strides = array<i32>} : memref<1x4x16x16xf32, #tpu.memory_space<vmem>>, vector<1x1x16x16xf32>,
    return
  }
  func.func @transform_0(%arg0: i32, %arg1: i32) -> (i32, i32, i32) {
    %c0_i32 = arith.constant 0 : i32
    %c0_i32_0 = arith.constant 0 : i32
    return %arg0, %arg1, %c0_i32 : i32, i32, i32
  }
  func.func @transform_1(%arg0: i32, %arg1: i32) -> (i32, i32) {
    %c0_i32 = arith.constant 0 : i32
    %c0_i32_0 = arith.constant 0 : i32
    %c0_i32_1 = arith.constant 0 : i32
    return %c0_i32, %c0_i32_0 : i32, i32
  }
  func.func @transform_2(%arg0: i32, %arg1: i32) -> (i32, i32, i32) {
    %c0_i32 = arith.constant 0 : i32
    %c0_i32_0 = arith.constant 0 : i32
    %c0_i32_1 = arith.constant 0 : i32
    %c0_i32_2 = arith.constant 0 : i32
    return %c0_i32, %c0_i32_0, %c0_i32_1 : i32, i32, i32
  }
  func.func @transform_3(%arg0: i32, %arg1: i32) -> (i32, i32) {
    %c0_i32 = arith.constant 0 : i32
    %c0_i32_0 = arith.constant 0 : i32
    %c0_i32_1 = arith.constant 0 : i32
    return %c0_i32, %c0_i32_0 : i32, i32
  }
  func.func @transform_4(%arg0: i32, %arg1: i32) -> (i32, i32) {
    %c0_i32 = arith.constant 0 : i32
    %c0_i32_0 = arith.constant 0 : i32
    %c0_i32_1 = arith.constant 0 : i32
    return %c0_i32, %c0_i32_0 : i32, i32
  }
  func.func @transform_5(%arg0: i32, %arg1: i32) -> (i32, i32, i32, i32) {
    %c0_i32 = arith.constant 0 : i32
    %c0_i32_0 = arith.constant 0 : i32
    %c0_i32_1 = arith.constant 0 : i32
    return %arg0, %c0_i32, %arg1, %c0_i32_0 : i32, i32, i32, i32
  }
  func.func @transform_6(%arg0: i32, %arg1: i32) -> (i32, i32, i32) {
    %c0_i32 = arith.constant 0 : i32
    %c0_i32_0 = arith.constant 0 : i32
    return %arg0, %arg1, %c0_i32 : i32, i32, i32
  }
  func.func @transform_7(%arg0: i32, %arg1: i32) -> (i32, i32, i32) {
    %c0_i32 = arith.constant 0 : i32
    %c0_i32_0 = arith.constant 0 : i32
    return %arg0, %arg1, %c0_i32 : i32, i32, i32
  }
}

</mosaic_0001>

<bundles_post_ra>
// kernel: tpu_custom_call.1
= control target key start
LH: loop header
LB: loop body
LE: loop exit
PB: predicated region body
PF: predicated region fallthrough
CT: control target
= control target key end

     0   :  { %s1787_s0 = inlined_call_operand.vmem [shape: f32[2,16,32], index: 0, kind: input, shape index: {}]   ;;  %s1788_s1 = inlined_call_operand.vmem [shape: f32[1,32], index: 1, kind: input, shape index: {}]   ;;  %s1789_s2 = inlined_call_operand.vmem [shape: f32[4,32,16], index: 2, kind: input, shape index: {}]   ;;  %s1790_s3 = inlined_call_operand.vmem [shape: f32[32,16], index: 3, kind: input, shape index: {}]   ;;  %s1791_s4 = inlined_call_operand.vmem [shape: f32[32,16], index: 4, kind: input, shape index: {}]   ;;  %s1792_s5 = inlined_call_operand.hbm [shape: f32[2,4,16,16], index: 5, kind: output, shape index: {0}]   ;;  %s1793_s6 = inlined_call_operand.hbm [shape: f32[2,16,16], index: 6, kind: output, shape index: {1}]   ;;  %s1794_s7 = inlined_call_operand.hbm [shape: f32[2,16,16], index: 7, kind: output, shape index: {2}]  }
   0x1   :  { %1796 = sst [smem:[#allocation9_spill]] %s1787_s0 }
   0x2   :  { %1797 = sst [smem:[#allocation10_spill]] %s1788_s1 }
   0x3   :  { %1798 = sst [smem:[#allocation11_spill]] %s1789_s2 }
   0x4   :  { %13 = vsyncpa [#allocation3], 0 }
   0x5   :  { %15 = vsyncpa [#allocation3 + $0x1], 0 }
   0x6   :  { %16 = vsyncpa [#allocation5], 0 }
   0x7   :  { %18 = vsyncpa [#allocation5 + $0x1], 0  ;;  %s1304_s24 = smov 0   ;;  %s1306_s25 = smov 0  }
   0x8   :  { %s1308_s26 = smov 0   ;;  %s1310_s27 = smov 0  }
   0x9   :  { %s1312_s28 = smov 0   ;;  %s1314_s29 = smov 0  }
   0xa LB: > { %s963_s30 = sadd.s32 4294967295, %s1259_s29   ;;  %s1795_s8 = sadd.s32 4294967294, %s1259_s29   ;;  %s1259_s29 = sphi %s1314_s29, %s24_s29   ;;  %s1255_s28 = sphi %s1312_s28, %s1815_s28   ;;  %s1251_s27 = sphi %s1310_s27, %s1814_s27   ;;  %s1247_s26 = sphi %s1308_s26, %s1813_s26   ;;  %s1243_s25 = sphi %s1306_s25, %s1812_s25   ;;  %s1239_s24 = sphi %s1304_s24, %s1811_s24  }
   0xb   : > { %s36_s9 = sadd.s32 1, %s1255_s28  ;;  %s157_s10 = sadd.s32 1, %s1247_s26 }
   0xc   : > { %p38_p0 = scmp.ge.s32.totalorder %s36_s9, 2  ;;  %p167_p1 = scmp.ne.s32.totalorder %s1247_s26, %s1243_s25 }
   0xd   : > { %p168_p2 = scmp.eq.s32.totalorder %s963_s30, 1  ;;  %p173_p3 = scmp.ne.s32.totalorder %s1243_s25, %s1239_s24 }
   0xe   : > { %s1817_s9 = smov (%p38_p0, %s36_s9), 0  ;;  %p174_p5 = scmp.eq.s32.totalorder %s1795_s8, 1 }
   0xf   : > { %p1346_p4 = por %p168_p2, %p167_p1  ;;  %s152_s12 = ssub.s32 %s1255_s28, %s1817_s9 }
  0x10   : > { %p967_p6 = scmp.ge.s32.totalorder %s1259_s29, 1  ;;  %p155_p7 = scmp.eq.s32.totalorder %s152_s12, 0 }
  0x11   : > { %p1355_p8 = por %p174_p5, %p173_p3  ;;  %p273_p9 = scmp.lt.s32.totalorder %s1259_s29, 3 }
  0x12   : > { %s1361_s14 = scalar_select %p155_p7, %s1247_s26, %s157_s10  }
  0x13   : > { %p274_p10 = pnand %p967_p6, %p273_p9 }
  0x14   : > { %p320_p11 = scmp.lt.s32.totalorder (!%p274_p10), %s1251_s27, 1  ;;  %s1801_s0 = sld [smem:[#allocation9_spill]] (!%p274_p10) }
  0x15   : > { %277 = sbr.rel (%p274_p10) target bundleno = 626 (0x272), region = 40  ;;  %s1802_s2 = sld [smem:[#allocation11_spill]] (!%p274_p10) }
  0x16   : > { %s1803_s1 = sld [smem:[#allocation10_spill]] (!%p274_p10)  ;;  %s1016_s18 = sshll.u32 (!%p274_p10), %s1251_s27, 4 }
  0x17   : > { %s1587_s10 = scalar_lea.hbm (!%p274_p10), %s1793_s6, %s1016_s18  ;;  %s1601_s22 = scalar_lea.hbm (!%p274_p10), %s1794_s7, %s1016_s18 }
  0x18   : > { %s1609_s23 = sand.u32 (!%p274_p10), 1, %s963_s30   ;;  %s795_s18 = sshll.u32 (!%p274_p10), %s1587_s10, 4  ;;  %s1635_s18 = int_to_ptr.hbm [resolvable:$true] %s795_s18 }
  0x19   : > { %s814_s30 = sshll.u32 (!%p274_p10), %s1601_s22, 4  ;;  %s1141_s8 = scalar_lea.hbm (!%p274_p10), %s1793_s6, 32  ;;  %s1645_s30 = int_to_ptr.hbm [resolvable:$true] %s814_s30 }
  0x1a   : > { %s321_s15 = scalar_select %p320_p11, %s1251_s27, 1  ;;  %vm335_vm0 = vcmask 261120   ;;  %v1261_v4 = vmov 32.0   ;;  %v395_v21 = vld [vmem:[%s1790_s3 + $0x18] sm:$0xff]  ;;  %v394_v23 = vld [vmem:[%s1790_s3 + $0x10] sm:$0xff]  ;;  %v393_v25 = vld [vmem:[%s1790_s3 + $0x8] sm:$0xff] }
  0x1b   : > { %1095 = vrcp.f32 %v1261_v4  ;;  %v428_v22 = vld [vmem:[%s1791_s4 + $0x18] sm:$0xff]  ;;  %1018 = vmatpush.msra.mxu2 %v395_v21  ;;  %v427_v24 = vld [vmem:[%s1791_s4 + $0x10] sm:$0xff]  ;;  %414 = vmatpush.msra.mxu0 %v395_v21  ;;  %v426_v26 = vld [vmem:[%s1791_s4 + $0x8] sm:$0xff]  ;;  %vm454_vm8 = vcmask 130048  }
  0x1c   : > { %s1014_s16 = sshll.u32 %s321_s15, 4  ;;  %1022 = vmatpush.msra.mxu3 %v428_v22  ;;  %441 = vmatpush.msra.mxu1 %v428_v22  ;;  %v392_v27 = vld [vmem:[%s1790_s3] sm:$0xff]  ;;  %v494_v29 = vld [vmem:[%s1802_s2 + $0x18] sm:$0xff]  ;;  %v493_v31 = vld [vmem:[%s1802_s2 + $0x10] sm:$0xff]  ;;  %s1476_s15 = sand.u32 1, %s1243_s25  }
  0x1d   : > { %s327_s19 = scalar_lea.vmem %s1801_s0, %s1014_s16  ;;  %1019 = vmatpush.msra.mxu2 %v394_v23  ;;  %415 = vmatpush.msra.mxu0 %v394_v23  ;;  %v425_v28 = vld [vmem:[%s1791_s4] sm:$0xff]  ;;  %v982_v30 = vld [vmem:[%s1802_s2 + $0x38] sm:$0xff]  ;;  %v981_v32 = vld [vmem:[%s1802_s2 + $0x30] sm:$0xff]  ;;  %s969_s16 = sshll.u32 %s1476_s15, 4 }
  0x1e   : > { %v333_v0 = vld [vmem:[%s327_s19 + $0x8] sm:$0xff]  ;;  %v332_v2 = vld [vmem:[%s327_s19] sm:$0xff]  ;;  %1023 = vmatpush.msra.mxu3 %v427_v24  ;;  %442 = vmatpush.msra.mxu1 %v427_v24  ;;  %v990_v40 = vld [vmem:[%s1802_s2 + $0x58] sm:$0xff]  ;;  %s1483_s17 = scalar_lea.vmem [#allocation6], %s969_s16  ;;  %s968_s19 = sshll.u32 %s1476_s15, 6 }
  0x1f   : > { %v339_v1 = vsel %vm335_vm0, %v333_v0, 0.0  ;;  %v336_v3 = vsel %vm335_vm0, %v332_v2, 0.0  ;;  %1020 = vmatpush.msra.mxu2 %v393_v25  ;;  %416 = vmatpush.msra.mxu0 %v393_v25  ;;  %v492_v33 = vld [vmem:[%s1802_s2 + $0x8] sm:$0xff]  ;;  %v491_v37 = vld [vmem:[%s1802_s2] sm:$0xff]  ;;  %v998_v41 = vld [vmem:[%s1802_s2 + $0x78] sm:$0xff]  ;;  %s1568_s20 = scalar_lea.vmem [#allocation4], %s969_s16 }
  0x20   : > { %340 = vadd.xlane.f32.xlu0 %v339_v1  ;;  %1024 = vmatpush.msra.mxu3 %v426_v26  ;;  %v980_v34 = vld [vmem:[%s1802_s2 + $0x28] sm:$0xff]  ;;  %v979_v38 = vld [vmem:[%s1802_s2 + $0x20] sm:$0xff]  ;;  %v989_v42 = vld [vmem:[%s1802_s2 + $0x50] sm:$0xff]  ;;  %s793_s21 = sshll.u32 %s1568_s20, 4  ;;  %s812_s12 = sshll.u32 %s1483_s17, 4  ;;  %s1611_s21 = int_to_ptr.vmem [resolvable:$true] %s793_s21  ;;  %s1637_s12 = int_to_ptr.vmem [resolvable:$true] %s812_s12 }
  0x21   : > { %v1096_v5 = vpop.eup %1095  ;;  %443 = vmatpush.msra.mxu1 %v426_v26  ;;  %1021 = vmatpush.msra.mxu2 %v392_v27  ;;  %v997_v43 = vld [vmem:[%s1802_s2 + $0x70] sm:$0xff]  ;;  %v988_v44 = vld [vmem:[%s1802_s2 + $0x48] sm:$0xff]  ;;  %v987_v47 = vld [vmem:[%s1802_s2 + $0x40] sm:$0xff]  ;;  %s1627_s10 = scalar_lea.vmem [#allocation2], %s968_s19  ;;  %s1135_s19 = sshra.s32 %s1635_s18, 4  ;;  %s1136_s19 = int_to_ptr.hbm [resolvable:$true] %s1135_s19 }
  0x22   : > { %v343_v6 = vmul.f32 32.0, %v1096_v5  ;;  %vm347_vm1 = vweird.f32 %v1096_v5  ;;  %1025 = vmatpush.msra.mxu3 %v425_v28  ;;  %417 = vmatpush.msra.mxu0 %v392_v27  ;;  %v996_v45 = vld [vmem:[%s1802_s2 + $0x68] sm:$0xff]  ;;  %v995_v48 = vld [vmem:[%s1802_s2 + $0x60] sm:$0xff]  ;;  %p1142_p1 = scmp.lt.s32.totalorder %s1136_s19, %s1793_s6 }
  0x23   : > { %444 = vmatpush.msra.mxu1 %v425_v28  ;;  %507 = vmatpush.msrb.mxu2 %v494_v29  ;;  %v1094_v59 = vld [vmem:[%s1803_s1] ss:$0 sm:$0xff] }
  0x24   : > { %v344_v7 = vsub.f32 1.0, %v343_v6  ;;  %571 = vmatpush.msrb.mxu3 %v982_v30  ;;  %636 = vmatpush.msrb.mxu0 %v990_v40 }
  0x25   : > { %508 = vmatpush.msrb.mxu2 %v493_v31  ;;  %701 = vmatpush.msrb.mxu1 %v998_v41 }
  0x26   : > { %v345_v8 = vmul.f32 %v1096_v5, %v344_v7  ;;  %572 = vmatpush.msrb.mxu3 %v981_v32  ;;  %637 = vmatpush.msrb.mxu0 %v989_v42 }
  0x27   : > { %509 = vmatpush.msrb.mxu2 %v492_v33  ;;  %702 = vmatpush.msrb.mxu1 %v997_v43 }
  0x28   : > { %337 = vadd.xlane.f32.xlu0 %v336_v3  ;;  %v346_v9 = vadd.f32 %v1096_v5, %v345_v8  ;;  %573 = vmatpush.msrb.mxu3 %v980_v34 }
  0x29   : > { %510 = vmatpush.msrb.mxu2 %v491_v37  ;;  %638 = vmatpush.msrb.mxu0 %v988_v44 }
  0x2a   : > { %v1370_v10 = vsel %vm347_vm1, %v1096_v5, %v346_v9  ;;  %574 = vmatpush.msrb.mxu3 %v979_v38  ;;  %703 = vmatpush.msrb.mxu1 %v996_v45 }
  0x2b   : > { %639 = vmatpush.msrb.mxu0 %v987_v47 }
  0x2c   : > { %704 = vmatpush.msrb.mxu1 %v995_v48 }
  0x93   : > { %v341_v11 = vpop.xlane.xlu0 %340 }
  0x94   : > { %v350_v12 = vmul.f32 %v1370_v10, %v341_v11 }
  0x96   : > { %v1373_v13 = vsub.f32 %v333_v0, %v350_v12 }
  0x98   : > { %v354_v14 = vmul.f32 %v1373_v13, %v1373_v13 }
  0x9a   : > { %v358_v15 = vsel %vm335_vm0, %v354_v14, 0.0 }
  0x9b   : > { %359 = vadd.xlane.f32.xlu1 %v358_v15  ;;  %v338_v16 = vpop.xlane.xlu0 %337 }
  0x9c   : > { %v349_v17 = vmul.f32 %v1370_v10, %v338_v16 }
  0x9e   : > { %v1379_v18 = vsub.f32 %v332_v2, %v349_v17 }
  0xa0   : > { %v353_v19 = vmul.f32 %v1379_v18, %v1379_v18 }
  0xa2   : > { %v355_v20 = vsel %vm335_vm0, %v353_v19, 0.0 }
  0xa3   : > { %356 = vadd.xlane.f32.xlu1 %v355_v20 }
 0x10e   : > { %v360_v35 = vpop.xlane.xlu1 %359 }
 0x10f   : > { %v362_v36 = vmul.f32 %v360_v35, %v1370_v10 }
 0x111   : > { %v364_v39 = vadd.f32 1e-05, %v362_v36 }
 0x113   : > { %1097 = vrsqrt.f32 %v364_v39  ;;  %vm381_vm3 = vweird.f32 %v364_v39 }
 0x116   : > { %v357_v46 = vpop.xlane.xlu1 %356 }
 0x117   : > { %v361_v49 = vmul.f32 %v357_v46, %v1370_v10 }
 0x119   : > { %v1098_v50 = vpop.eup %1097  ;;  %v363_v51 = vadd.f32 1e-05, %v361_v49 }
 0x11a   : > { %v376_v52 = vmul.f32 %v1098_v50, %v364_v39  ;;  %vm382_vm2 = vweird.f32 %v1098_v50 }
 0x11b   : > { %1099 = vrsqrt.f32 %v363_v51  ;;  %vm383_vm4 = vmor %vm381_vm3, %vm382_vm2  ;;  %vm371_vm6 = vweird.f32 %v363_v51 }
 0x11c   : > { %v377_v53 = vmul.f32 %v1098_v50, %v376_v52 }
 0x11e   : > { %v378_v54 = vmul.f32 0.5, %v377_v53 }
 0x120   : > { %v379_v55 = vsub.f32 1.5, %v378_v54 }
 0x121   : > { %v1100_v56 = vpop.eup %1099 }
 0x122   : > { %v380_v57 = vmul.f32 %v1098_v50, %v379_v55  ;;  %v366_v58 = vmul.f32 %v1100_v56, %v363_v51  ;;  %vm372_vm5 = vweird.f32 %v1100_v56 }
 0x123   : > { %vm373_vm7 = vmor %vm371_vm6, %vm372_vm5 }
 0x124   : > { %v384_v60 = vsel %vm383_vm4, %v1098_v50, %v380_v57  ;;  %v367_v61 = vmul.f32 %v1100_v56, %v366_v58 }
 0x125   : > { %v386_v62 = vmul.f32 %v384_v60, %v1373_v13 }
 0x126   : > { %v368_v63 = vmul.f32 0.5, %v367_v61 }
 0x127   : > { %v391_v0 = vmul.f32 %v1094_v59, %v386_v62 }
 0x128   : > { %v369_v1 = vsub.f32 1.5, %v368_v63 }
 0x129   : > { %974 = vmatmul.msk.f32.vlgmr.msra.gmra.mxu2 %vm335_vm0, %v391_v0  ;;  %976 = vmatmul.msk.f32.vlgmr.msra.gmra.mxu3 %vm335_vm0, %v391_v0 }
 0x12a   : > { %v370_v2 = vmul.f32 %v1100_v56, %v369_v1 }
 0x12c   : > { %v374_v3 = vsel %vm373_vm7, %v1100_v56, %v370_v2 }
 0x12d   : > { %v385_v4 = vmul.f32 %v374_v3, %v1379_v18 }
 0x12f   : > { %v390_v5 = vmul.f32 %v1094_v59, %v385_v4 }
 0x131   : > { %973 = vmatmul.msk.f32.vlgmr.msra.gmra.mxu0 %vm335_vm0, %v390_v5  ;;  %975 = vmatmul.msk.f32.vlgmr.msra.gmra.mxu1 %vm335_vm0, %v390_v5 }
 0x132   : > { %977 = vmatmul.msk.f32.vlgmr.msrb.gmra.mxu2 %vm335_vm0, %v390_v5  ;;  %983 = vmatmul.msk.f32.vlgmr.msrb.gmra.mxu3 %vm335_vm0, %v390_v5 }
 0x139   : > { %991 = vmatmul.msk.f32.vlgmr.msrb.gmra.mxu0 %vm335_vm0, %v390_v5  ;;  %999 = vmatmul.msk.f32.vlgmr.msrb.gmra.mxu1 %vm335_vm0, %v390_v5 }
 0x13a   : > { %978 = vmatmul.msk.f32.gmra.mxu2 %vm335_vm0, %v391_v0  ;;  %984 = vmatmul.msk.f32.gmra.mxu3 %vm335_vm0, %v391_v0 }
 0x141   : > { %992 = vmatmul.msk.f32.gmra.mxu0 %vm335_vm0, %v391_v0  ;;  %1000 = vmatmul.msk.f32.gmra.mxu1 %vm335_vm0, %v391_v0 }
 0x1ac   : > { %v1479_v6 = vpop.f32.mrf.mxu2  ;;  %v449_v7 = vpop.f32.mrf.mxu3 }
 0x1ad   : > { %490 = vst.msk [vmem:[%s1483_s17 + $0x8] sm:$0xff] %vm454_vm8, %v449_v7  ;;  %v453_v12 = vmul.f32 %v1479_v6, %v1479_v6 }
 0x1ae   : > { %v1487_v8 = vpop.f32.mrf.mxu0  ;;  %v446_v9 = vpop.f32.mrf.mxu1 }
 0x1af   : > { %489 = vst.msk [vmem:[%s1483_s17] sm:$0xff] %vm454_vm8, %v446_v9  ;;  %v452_v10 = vmul.f32 %v1487_v8, %v1487_v8  ;;  %v458_v21 = vsel %vm454_vm8, %v453_v12, 0.0 }
 0x1b1   : > { %v455_v11 = vsel %vm454_vm8, %v452_v10, 0.0 }
 0x1b2   : > { %456 = vadd.xlane.f32.xlu2 %v455_v11 }
 0x1b5   : > { %v1496_v13 = vpop.f32.mrf.mxu2  ;;  %v1498_v14 = vpop.f32.mrf.mxu3 }
 0x1b6   : > { %v518_v15 = vmul.f32 %v1496_v13, %v1496_v13  ;;  %v1502_v16 = vpop.f32.mrf.mxu0  ;;  %v1506_v18 = vpop.f32.mrf.mxu1  ;;  %v582_v22 = vmul.f32 %v1498_v14, %v1498_v14 }
 0x1b7   : > { %v647_v17 = vmul.f32 %v1502_v16, %v1502_v16  ;;  %v712_v32 = vmul.f32 %v1506_v18, %v1506_v18 }
 0x1b8   : > { %v520_v19 = vsel %vm454_vm8, %v518_v15, 0.0  ;;  %v584_v29 = vsel %vm454_vm8, %v582_v22, 0.0 }
 0x1b9   : > { %521 = vadd.xlane.f32.xlu0 %v520_v19  ;;  %v649_v20 = vsel %vm454_vm8, %v647_v17, 0.0  ;;  %v714_v35 = vsel %vm454_vm8, %v712_v32, 0.0 }
 0x1ba   : > { %650 = vadd.xlane.f32.xlu1 %v649_v20  ;;  %459 = vadd.xlane.f32.xlu2 %v458_v21 }
 0x1bd   : > { %v1513_v23 = vpop.f32.mrf.mxu2  ;;  %v1515_v24 = vpop.f32.mrf.mxu3 }
 0x1be   : > { %v519_v25 = vmul.f32 %v1513_v23, %v1513_v23  ;;  %v583_v26 = vmul.f32 %v1515_v24, %v1515_v24  ;;  %v1524_v30 = vpop.f32.mrf.mxu0  ;;  %v1526_v31 = vpop.f32.mrf.mxu1 }
 0x1bf   : > { %v648_v33 = vmul.f32 %v1524_v30, %v1524_v30  ;;  %v713_v34 = vmul.f32 %v1526_v31, %v1526_v31 }
 0x1c0   : > { %v587_v27 = vsel %vm454_vm8, %v583_v26, 0.0  ;;  %v523_v28 = vsel %vm454_vm8, %v519_v25, 0.0 }
 0x1c1   : > { %588 = vadd.xlane.f32.xlu0 %v587_v27  ;;  %v717_v36 = vsel %vm454_vm8, %v713_v34, 0.0  ;;  %v652_v37 = vsel %vm454_vm8, %v648_v33, 0.0 }
 0x1c2   : > { %524 = vadd.xlane.f32.xlu1 %v523_v28  ;;  %585 = vadd.xlane.f32.xlu2 %v584_v29 }
 0x1c9   : > { %715 = vadd.xlane.f32.xlu0 %v714_v35 }
 0x1ca   : > { %718 = vadd.xlane.f32.xlu1 %v717_v36  ;;  %653 = vadd.xlane.f32.xlu2 %v652_v37 }
 0x225   : > { %v457_v38 = vpop.xlane.xlu2 %456 }
 0x226   : > { %v461_v39 = vmax.f32 %v457_v38, 1e-24 }
 0x228   : > { %1101 = vrsqrt.f32 %v461_v39  ;;  %vm469_vm10 = vweird.f32 %v461_v39 }
 0x22c   : > { %v522_v40 = vpop.xlane.xlu0 %521 }
 0x22d   : > { %v526_v41 = vmax.f32 %v522_v40, 1e-24  ;;  %v651_v42 = vpop.xlane.xlu1 %650  ;;  %v460_v43 = vpop.xlane.xlu2 %459 }
 0x22e   : > { %v1102_v44 = vpop.eup %1101  ;;  %v1537_v45 = vmax.f32 %v651_v42, 1e-24  ;;  %v1539_v46 = vmax.f32 %v460_v43, 1e-24 }
 0x22f   : > { %v464_v47 = vmul.f32 %v1102_v44, %v461_v39  ;;  %1103 = vrsqrt.f32 %v526_v41  ;;  %vm470_vm9 = vweird.f32 %v1102_v44  ;;  %vm534_vm12 = vweird.f32 %v526_v41 }
 0x230   : > { %1105 = vrsqrt.f32 %v1537_v45  ;;  %vm471_vm11 = vmor %vm469_vm10, %vm470_vm9  ;;  %vm663_vm14 = vweird.f32 %v1537_v45  ;;  %vm479_vm2 = vweird.f32 %v1539_v46 }
 0x231   : > { %v465_v48 = vmul.f32 %v1102_v44, %v464_v47  ;;  %1107 = vrsqrt.f32 %v1539_v46 }
 0x233   : > { %v466_v49 = vmul.f32 0.5, %v465_v48 }
 0x234   : > { %v589_v50 = vpop.xlane.xlu0 %588 }
 0x235   : > { %v1104_v51 = vpop.eup %1103  ;;  %v467_v52 = vsub.f32 1.5, %v466_v49  ;;  %v1543_v53 = vmax.f32 %v589_v50, 1e-24  ;;  %v525_v54 = vpop.xlane.xlu1 %524 }
 0x236   : > { %v586_v55 = vpop.xlane.xlu2 %585  ;;  %v1106_v56 = vpop.eup %1105  ;;  %v529_v57 = vmul.f32 %v1104_v51, %v526_v41  ;;  %v1545_v58 = vmax.f32 %v525_v54, 1e-24  ;;  %vm535_vm13 = vweird.f32 %v1104_v51 }
 0x237   : > { %v1547_v59 = vmax.f32 %v586_v55, 1e-24  ;;  %v1549_v60 = vpop.eup %1107  ;;  %v468_v61 = vmul.f32 %v1102_v44, %v467_v52  ;;  %v658_v62 = vmul.f32 %v1106_v56, %v1537_v45  ;;  %1109 = vrsqrt.f32 %v1543_v53  ;;  %vm536_vm1 = vmor %vm534_vm12, %vm535_vm13 }
 0x238   : > { %v530_v63 = vmul.f32 %v1104_v51, %v529_v57  ;;  %v474_v0 = vmul.f32 %v1549_v60, %v1539_v46  ;;  %1111 = vrsqrt.f32 %v1545_v58  ;;  %vm664_vm15 = vweird.f32 %v1106_v56 }
 0x239   : > { %v472_v1 = vsel %vm471_vm11, %v1102_v44, %v468_v61  ;;  %v659_v2 = vmul.f32 %v1106_v56, %v658_v62  ;;  %1113 = vrsqrt.f32 %v1547_v59  ;;  %vm480_vm0 = vweird.f32 %v1549_v60  ;;  %vm665_vm3 = vmor %vm663_vm14, %vm664_vm15 }
 0x23a   : > { %v483_v3 = vmul.f32 4.0, %v472_v1  ;;  %v531_v4 = vmul.f32 0.5, %v530_v63  ;;  %v475_v5 = vmul.f32 %v1549_v60, %v474_v0  ;;  %vm481_vm4 = vmor %vm479_vm2, %vm480_vm0  ;;  %vm608_vm6 = vweird.f32 %v1543_v53 }
 0x23b   : > { %v660_v7 = vmul.f32 0.5, %v659_v2  ;;  %vm544_vm11 = vweird.f32 %v1545_v58 }
 0x23c   : > { %v485_v9 = vmul.f32 %v483_v3, %v1487_v8  ;;  %v532_v10 = vsub.f32 1.5, %v531_v4  ;;  %v476_v11 = vmul.f32 0.5, %v475_v5  ;;  %v716_v12 = vpop.xlane.xlu0 %715 }
 0x23d   : > { %v1560_v15 = vpop.eup %1109  ;;  %v661_v17 = vsub.f32 1.5, %v660_v7  ;;  %v1563_v19 = vmax.f32 %v716_v12, 1e-24  ;;  %v719_v20 = vpop.xlane.xlu1 %718 }
 0x23e   : > { %487 = vst.msk [vmem:[%s1568_s20] sm:$0xff] %vm454_vm8, %v485_v9  ;;  %v533_v8 = vmul.f32 %v1104_v51, %v532_v10  ;;  %v477_v21 = vsub.f32 1.5, %v476_v11  ;;  %v603_v22 = vmul.f32 %v1560_v15, %v1543_v53  ;;  %v1575_v25 = vpop.eup %1111  ;;  %v1582_v27 = vmax.f32 %v719_v20, 1e-24  ;;  %v654_v42 = vpop.xlane.xlu2 %653 }
 0x23f   : > { %v662_v26 = vmul.f32 %v1106_v56, %v661_v17  ;;  %1115 = vrsqrt.f32 %v1563_v19  ;;  %v1589_v28 = vpop.eup %1113  ;;  %v539_v34 = vmul.f32 %v1575_v25, %v1545_v58  ;;  %vm609_vm5 = vweird.f32 %v1560_v15 }
 0x240   : > { %v537_v29 = vsel %vm536_vm1, %v1104_v51, %v533_v8  ;;  %v478_v32 = vmul.f32 %v1549_v60, %v477_v21  ;;  %v604_v33 = vmul.f32 %v1560_v15, %v603_v22  ;;  %v593_v37 = vmul.f32 %v1589_v28, %v1547_v59  ;;  %vm1651_vm9 = vmor %vm608_vm6, %vm609_vm5 }
 0x241   : > { %v548_v35 = vmul.f32 4.0, %v537_v29  ;;  %v666_v36 = vsel %vm665_vm3, %v1106_v56, %v662_v26  ;;  %v540_v41 = vmul.f32 %v1575_v25, %v539_v34  ;;  %1117 = vrsqrt.f32 %v1582_v27 }
 0x242   : > { %v677_v38 = vmul.f32 4.0, %v666_v36  ;;  %v482_v39 = vsel %vm481_vm4, %v1549_v60, %v478_v32  ;;  %v605_v40 = vmul.f32 0.5, %v604_v33  ;;  %v594_v45 = vmul.f32 %v1589_v28, %v593_v37 }
 0x243   : > { %v550_v43 = vmul.f32 %v548_v35, %v1496_v13  ;;  %v484_v44 = vmul.f32 4.0, %v482_v39  ;;  %v541_v48 = vmul.f32 0.5, %v540_v41  ;;  %vm545_vm7 = vweird.f32 %v1575_v25 }
 0x244   : > { %v679_v46 = vmul.f32 %v677_v38, %v1502_v16  ;;  %v606_v47 = vsub.f32 1.5, %v605_v40  ;;  %v595_v50 = vmul.f32 0.5, %v594_v45  ;;  %v1633_v16 = vmax.f32 %v654_v42, 1e-24 }
 0x245   : > { %v1623_v49 = vpop.eup %1115  ;;  %552 = vst.msk [vmem:[%s1627_s10] sm:$0xff] %vm454_vm8, %v550_v43  ;;  %v486_v13 = vmul.f32 %v484_v44, %v1479_v6  ;;  %v542_v52 = vsub.f32 1.5, %v541_v48  ;;  %vm599_vm10 = vweird.f32 %v1589_v28 }
 0x246   : > { %993 = vst.msk [vmem:[%s1627_s10 + $0x20] sm:$0xff] %vm454_vm8, %v679_v46  ;;  %v607_v51 = vmul.f32 %v1560_v15, %v606_v47  ;;  %v723_v6 = vmul.f32 %v1623_v49, %v1563_v19  ;;  %v596_v54 = vsub.f32 1.5, %v595_v50  ;;  %1119 = vrsqrt.f32 %v1633_v16 }
 0x247   : > { %488 = vst.msk [vmem:[%s1568_s20 + $0x8] sm:$0xff] %vm454_vm8, %v486_v13  ;;  %v543_v56 = vmul.f32 %v1575_v25, %v542_v52  ;;  %s1137_s20 = scalar_lea.hbm %s1136_s19, 16 }
 0x248   : > { %v611_v55 = vsel %vm1651_vm9, %v1560_v15, %v607_v51  ;;  %v724_v57 = vmul.f32 %v1623_v49, %v723_v6  ;;  %p1138_p12 = scmp.ne.s32.totalorder %s1136_s19, %s1137_s20  ;;  %p1143_p2 = scmp.lt.s32.totalorder %s1141_s8, %s1137_s20 }
 0x24a   : > { %p1139_p13 = pnand %p1138_p12, %p1346_p4  ;;  %p1144_p3 = por %p1143_p2, %p1142_p1 }
 0x24c   : > { %p1140_p0 = pneg %p1139_p13 }
 0x24e   : > { %p1145_p5 = pnand %p1144_p3, %p1140_p0 }
 0x250   : > { %1148 = shalt.err (!%p1145_p5)
}
 0x251   : > { %s1262_s17 = smov 128   ;;  %s1263_s2 = smov 8   ;;  %v613_v60 = vmul.f32 4.0, %v611_v55  ;;  %vm1686_vm12 = vmor %vm544_vm11, %vm545_vm7  ;;  %v597_v62 = vmul.f32 %v1589_v28, %v596_v54  ;;  %vm598_vm13 = vweird.f32 %v1547_v59 }
 0x252   : > { %s1806_s16 = scalar_lea.sflag [#allocation5], %s1609_s23  ;;  %s1163_s0 = sshra.s32 %s1645_s30, 4  ;;  %s1164_s0 = int_to_ptr.hbm [resolvable:$true] %s1163_s0 }
 0x253   : > { %1027 = dma.vmem_to_hbm [thread:$0]  (%p1346_p4), %s1611_s21, 256, %s1635_s18, %s1806_s16, %s1262_s17, %s1262_s17, %s1263_s2  }
 0x254   : > { %s1165_s1 = scalar_lea.hbm %s1164_s0, 16  ;;  %s1169_s18 = scalar_lea.hbm %s1794_s7, 32 }
 0x255   : > { %p1166_p6 = scmp.ne.s32.totalorder %s1164_s0, %s1165_s1  ;;  %p1170_p10 = scmp.lt.s32.totalorder %s1164_s0, %s1794_s7 }
 0x256   : > { %p1171_p11 = scmp.lt.s32.totalorder %s1169_s18, %s1165_s1 }
 0x257   : > { %p1167_p7 = pnand %p1166_p6, %p1346_p4 }
 0x258   : > { %p1172_p12 = por %p1171_p11, %p1170_p10 }
 0x259   : > { %p1168_p9 = pneg %p1167_p7 }
 0x25b   : > { %p1173_p13 = pnand %p1172_p12, %p1168_p9 }
 0x25d   : > { %1176 = shalt.err (!%p1173_p13)
}
 0x25e   : > { %s1809_s22 = smov %s1806_s16  ;;  %v1118_v58 = vpop.eup %1117  ;;  %v547_v63 = vsel %vm1686_vm12, %v1575_v25, %v543_v56  ;;  %vm600_vm14 = vmor %vm598_vm13, %vm599_vm10  ;;  %v725_v0 = vmul.f32 0.5, %v724_v57  ;;  %v615_v1 = vmul.f32 %v613_v60, %v1515_v24  ;;  %vm729_vm15 = vweird.f32 %v1623_v49  ;;  %s1015_s23 = sshll.u32 %s1251_s27, 6 }
 0x25f   : > { %1028 = dma.vmem_to_hbm [thread:$0]  (%p1346_p4), %s1637_s12, 256, %s1645_s30, %s1809_s22, %s1262_s17, %s1262_s17, %s1263_s2   ;;  %v549_v2 = vmul.f32 4.0, %v547_v63  ;;  %v601_v3 = vsel %vm600_vm14, %v1589_v28, %v597_v62  ;;  %v733_v4 = vmul.f32 %v1118_v58, %v1582_v27  ;;  %v1120_v9 = vpop.eup %1119  ;;  %vm728_vm0 = vweird.f32 %v1563_v19 }
 0x260   : > { %v612_v5 = vmul.f32 4.0, %v601_v3  ;;  %v726_v7 = vsub.f32 1.5, %v725_v0  ;;  %986 = vst.msk [vmem:[%s1627_s10 + $0x18] sm:$0xff] %vm454_vm8, %v615_v1  ;;  %v668_v12 = vmul.f32 %v1120_v9, %v1633_v16  ;;  %vm730_vm1 = vmor %vm728_vm0, %vm729_vm15  ;;  %vm739_vm2 = vweird.f32 %v1118_v58  ;;  %s773_s16 = scalar_lea.hbm %s1792_s5, %s1015_s23  ;;  %s774_s27 = sshll.u32 %s1627_s10, 4  ;;  %s775_s27 = int_to_ptr.vmem [resolvable:$true] %s774_s27 }
 0x261   : > { %v551_v59 = vmul.f32 %v549_v2, %v1513_v23  ;;  %v734_v10 = vmul.f32 %v1118_v58, %v733_v4  ;;  %vm738_vm3 = vweird.f32 %v1582_v27  ;;  %vm674_vm5 = vweird.f32 %v1120_v9  ;;  %s776_s0 = sshll.u32 %s773_s16, 4  ;;  %s750_s1 = scalar_lea.sflag [#allocation3], %s1476_s15  ;;  %s777_s0 = int_to_ptr.hbm [resolvable:$true] %s776_s0 }
 0x262   : > { %v614_v11 = vmul.f32 %v612_v5, %v1498_v14  ;;  %v727_v24 = vmul.f32 %v1623_v49, %v726_v7  ;;  %v669_v23 = vmul.f32 %v1120_v9, %v668_v12  ;;  %vm740_vm4 = vmor %vm738_vm3, %vm739_vm2  ;;  %vm673_vm6 = vweird.f32 %v1633_v16  ;;  %s1191_s8 = sshra.s32 %s777_s0, 4  ;;  %s1197_s20 = scalar_lea.hbm %s1792_s5, 128  ;;  %s1192_s8 = int_to_ptr.hbm [resolvable:$true] %s1191_s8 }
 0x263   : > { %553 = vst.msk [vmem:[%s1627_s10 + $0x8] sm:$0xff] %vm454_vm8, %v551_v59  ;;  %v735_v15 = vmul.f32 0.5, %v734_v10  ;;  %vm675_vm7 = vmor %vm673_vm6, %vm674_vm5  ;;  %s1193_s21 = scalar_lea.hbm %s1192_s8, 64  ;;  %p1198_p3 = scmp.lt.s32.totalorder %s1192_s8, %s1792_s5 }
 0x264   : > { %985 = vst.msk [vmem:[%s1627_s10 + $0x10] sm:$0xff] %vm454_vm8, %v614_v11  ;;  %v731_v17 = vsel %vm730_vm1, %v1623_v49, %v727_v24  ;;  %v670_v14 = vmul.f32 0.5, %v669_v23  ;;  %p1194_p0 = scmp.ne.s32.totalorder %s1192_s8, %s1193_s21  ;;  %p1199_p5 = scmp.lt.s32.totalorder %s1197_s20, %s1193_s21 }
 0x265   : > { %v742_v20 = vmul.f32 4.0, %v731_v17  ;;  %v736_v8 = vsub.f32 1.5, %v735_v15 }
 0x266   : > { %v671_v22 = vsub.f32 1.5, %v670_v14  ;;  %p1195_p1 = pnand %p1194_p0, %p1346_p4  ;;  %p1200_p6 = por %p1199_p5, %p1198_p3 }
 0x267   : > { %v744_v19 = vmul.f32 %v742_v20, %v1506_v18  ;;  %v737_v21 = vmul.f32 %v1118_v58, %v736_v8 }
 0x268   : > { %v672_v28 = vmul.f32 %v1120_v9, %v671_v22  ;;  %p1196_p2 = pneg %p1195_p1 }
 0x269   : > { %1001 = vst.msk [vmem:[%s1627_s10 + $0x30] sm:$0xff] %vm454_vm8, %v744_v19  ;;  %v741_v25 = vsel %vm740_vm4, %v1118_v58, %v737_v21 }
 0x26a   : > { %v743_v26 = vmul.f32 4.0, %v741_v25  ;;  %v676_v27 = vsel %vm675_vm7, %v1120_v9, %v672_v28  ;;  %p1201_p7 = pnand %p1200_p6, %p1196_p2 }
 0x26b   : > { %v678_v29 = vmul.f32 4.0, %v676_v27 }
 0x26c   : > { %v745_v18 = vmul.f32 %v743_v26, %v1526_v31 }
 0x26d   : > { %v680_v32 = vmul.f32 %v678_v29, %v1524_v30 }
 0x26e   : > { %1002 = vst.msk [vmem:[%s1627_s10 + $0x38] sm:$0xff] %vm454_vm8, %v745_v18 }
 0x26f   : > { %994 = vst.msk [vmem:[%s1627_s10 + $0x28] sm:$0xff] %vm454_vm8, %v680_v32 }
 0x270   : > { %1204 = shalt.err (!%p1201_p7)
}
 0x271   : > { %1026 = dma.vmem_to_hbm [thread:$0]  (%p1346_p4), %s775_s27, 1024, %s777_s0, %s750_s1, %s1262_s17, %s1262_s17, %s1263_s2  }
 0x272 PF: > { %p1042_p9 = scmp.ge.s32.totalorder %s1259_s29, 2  ;;  %s829_s15 = sand.u32 1, %s1239_s24  }
 0x273   : > { %s830_s10 = scalar_lea.sflag [#allocation3], %s829_s15 }
 0x274   : > { %p1033_p10 = pnand %p1042_p9, %p1355_p8 }
 0x276   : > { %p1034_p11 = pneg %p1033_p10 }
 0x278   : > { %1230 = dma.done.wait (%p1034_p11), %s830_s10, 1024  }
 0x279   : > { %1232 = vsyncadd (%p1034_p11), %s830_s10, 4294966272  ;;  %s1810_s12 = sadd.s32 4294967294, %s1259_s29  }
 0x27a   : > { %s839_s30 = sand.u32 1, %s1810_s12  }
 0x27b   : > { %s840_s11 = scalar_lea.sflag [#allocation5], %s839_s30 }
 0x27c   : > { %1234 = dma.done.wait (%p1034_p11), %s840_s11, 512  }
 0x27d   : > { %1236 = vsyncadd (%p1034_p11), %s840_s11, 4294966784  ;;  %s24_s29 = sadd.s32 1, %s1259_s29   ;;  %s1811_s24 = smov %s1243_s25 }
 0x27e   : > { %p21_p4 = scmp.ge.s32.totalorder %s24_s29, 4   ;;  %s1812_s25 = smov %s1247_s26 }
 0x27f   : > { %s1813_s26 = smov %s1361_s14  ;;  %s1814_s27 = smov %s1255_s28 }
 0x280   : > { %s1815_s28 = smov %s1817_s9  ;;  %23 = sbr.rel (!%p21_p4) target bundleno = 10 (0xa), region = 113 }
 0x285   :  { %856 = vsyncpa [#allocation3], 1 }
 0x286   :  { %858 = vsyncpa [#allocation3 + $0x1], 1 }
 0x287   :  { %859 = vsyncpa [#allocation5], 1 }
 0x288   :  { %861 = vsyncpa [#allocation5 + $0x1], 1 }

</bundles_post_ra>
